<compile_context>
chip_gen: v6e
topology: v6e:2x2x1
jax: 0.10.0
libtpu: 0.0.40
codegen_flags: <defaults>
</compile_context>

<pallas_src>
import jax
import jax.numpy as jnp
from jax.experimental import pallas as pl
from jax.experimental.pallas import tpu as pltpu


def _round_up(n: int, m: int) -> int:
    return ((n + m - 1) // m) * m


def _lyapunov_mlp_kernel(x_ref, w1_ref, b1_ref, w2_ref, b2_ref, w3_ref, b3_ref,
                         o_ref):
    """Fused 3-layer MLP: (Linear+ReLU) x2 -> Linear -> Softplus.

    x_ref  : (bt, D)  f32   batch on sublanes, features on lanes
    w1_ref : (D, H1)  f32
    b1_ref : (1, H1)  f32
    w2_ref : (H1, H2) bf16
    b2_ref : (1, H2)  f32
    w3_ref : (8, H2)  f32   row 0 holds w3^T (padded to 8 sublanes)
    b3_ref : (1, 1)   f32   SMEM scalar
    o_ref  : (1, bt)  f32   lane-dense output row for this batch tile
    """
    x = x_ref[...]                                        # (bt, D) f32
    d_in = x.shape[1]                                     # static

    # ---- Layer 1: Linear(D -> H1) + ReLU on the VPU (K=D is tiny, keep the
    # MXU free). D is static so this unrolls into D broadcast multiply-adds.
    acc = x[:, 0:1] * w1_ref[0:1, :]                      # (bt,1)*(1,H1)->(bt,H1)
    for d in range(1, d_in):
        acc = acc + x[:, d:d + 1] * w1_ref[d:d + 1, :]
    h1 = jnp.maximum(acc + b1_ref[...], 0.0)              # bias fused in epilogue

    # ---- Layer 2: Linear(H1 -> H2) + ReLU on the MXU, bf16 operands with f32
    # accumulation.
    h2 = jnp.dot(h1.astype(jnp.bfloat16), w2_ref[...],
                 preferred_element_type=jnp.float32) + b2_ref[...]
    h2 = jnp.maximum(h2, 0.0)                             # (bt, H2) f32

    # ---- Layer 3: Linear(H2 -> 1). Contract the feature axis with batch
    # landing on lanes (the q@k^T pattern), so z is a lane-dense row.
    z8 = jax.lax.dot_general(w3_ref[...], h2,
                             dimension_numbers=(((1,), (1,)), ((), ())),
                             preferred_element_type=jnp.float32)   # (8, bt)
    z = z8[0:1, :] + b3_ref[0, 0]                          # (1, bt)

    # ---- Softplus (numerically stable): max(z,0) + log1p(exp(-|z|)).
    sp = jnp.maximum(z, 0.0) + jnp.log1p(jnp.exp(-jnp.abs(z)))
    o_ref[...] = sp.astype(o_ref.dtype)


def lyapunov_forward(x, params, *, batch_tile=512):
    """Run the fused Lyapunov MLP Pallas kernel.

    Args:
      x: (B, input_dim) float32 state batch (any B; padded internally).
      params: dict with w1 (D,H1), b1 (1,H1), w2 (H1,H2), b2 (1,H2),
              w3 (H2,1), b3 (1,1), stored as (in, out) so the math is x @ W + b.
      batch_tile: rows per grid step; must be a multiple of 128.
    Returns:
      V(x) of shape (B, 1), float32.
    """
    B, D = x.shape
    w1, b1 = params["w1"], params["b1"]
    w2, b2 = params["w2"], params["b2"]
    w3, b3 = params["w3"], params["b3"]
    H1 = w1.shape[1]
    H2 = w2.shape[1]

    assert batch_tile > 0 and batch_tile % 128 == 0, \
        "batch_tile must be a positive multiple of 128"

    # Effective tile / padded batch (ragged batches are zero-padded).
    bt = min(batch_tile, _round_up(B, 128))
    B_pad = _round_up(B, bt)
    if B_pad != B:
        x = jnp.pad(x, ((0, B_pad - B), (0, 0)))
    grid = (B_pad // bt,)

    # One-time parameter prep (tiny; folds away under jit).
    w1_f32 = w1.astype(jnp.float32)
    b1_r = b1.reshape(1, H1).astype(jnp.float32)
    w2_bf16 = w2.astype(jnp.bfloat16)                      # bf16 MXU operands
    b2_r = b2.reshape(1, H2).astype(jnp.float32)
    w3_row8 = jnp.broadcast_to(w3.reshape(1, H2).astype(jnp.float32), (8, H2))
    b3_s = b3.reshape(1, 1).astype(jnp.float32)            # SMEM scalar

    full2d = lambda r, c: pl.BlockSpec((r, c), lambda i: (0, 0))

    out = pl.pallas_call(
        _lyapunov_mlp_kernel,
        out_shape=jax.ShapeDtypeStruct((1, B_pad), jnp.float32),
        grid_spec=pltpu.PrefetchScalarGridSpec(
            num_scalar_prefetch=0,
            grid=grid,
            in_specs=[
                pl.BlockSpec((bt, D), lambda i: (i, 0)),          # x tile
                full2d(D, H1), full2d(1, H1),                     # layer 1
                full2d(H1, H2), full2d(1, H2),                    # layer 2
                full2d(8, H2),                                    # layer 3 weights
                pl.BlockSpec(memory_space=pltpu.MemorySpace.SMEM),  # b3 scalar
            ],
            out_specs=pl.BlockSpec((1, bt), lambda i: (0, i)),    # lane-dense row
        ),
        compiler_params=pltpu.CompilerParams(
            dimension_semantics=("parallel",),     # shards grid across TCs on v7x
            vmem_limit_bytes=32 * 1024 * 1024,     # headroom for very large tiles
        ),
        cost_estimate=pl.CostEstimate(
            flops=2 * B_pad * (D * H1 + H1 * H2 + H2),
            transcendentals=2 * B_pad,             # exp + log1p per output
            bytes_accessed=(4 * B_pad * (D + 1)
                            + 4 * (w1.size + H1 + H2 + 8 * H2 + 1)
                            + 2 * w2.size),
        ),
    )(x, w1_f32, b1_r, w2_bf16, b2_r, w3_row8, b3_s)

    return out.reshape(-1, 1)[:B]


def init_params(key, input_dim, hidden_dims):
    """Deterministic synthetic parameter init (matches module's layer shapes)."""
    dims = [input_dim] + list(hidden_dims) + [1]
    params = {}
    keys = jax.random.split(key, len(dims) - 1)
    for i, (din, dout) in enumerate(zip(dims[:-1], dims[1:])):
        kw, kb = jax.random.split(keys[i])
        bound = 1.0 / jnp.sqrt(din)
        # stored as (in, out) so the kernel computes x @ W
        params[f"w{i+1}"] = jax.random.uniform(
            kw, (din, dout), jnp.float32, -bound, bound)
        params[f"b{i+1}"] = jax.random.uniform(
            kb, (1, dout), jnp.float32, -bound, bound)
    return params


def _reference_forward(x, params):
    """Pure-JAX reference mirroring the kernel's bf16 layer-2 numerics."""
    h1 = jnp.maximum(x @ params["w1"] + params["b1"], 0.0)
    h2 = jnp.maximum(
        jnp.dot(h1.astype(jnp.bfloat16), params["w2"].astype(jnp.bfloat16),
                preferred_element_type=jnp.float32) + params["b2"], 0.0)
    z = h2 @ params["w3"] + params["b3"]
    return jnp.maximum(z, 0.0) + jnp.log1p(jnp.exp(-jnp.abs(z)))


if __name__ == "__main__":
    input_dim = 4
    hidden_dims = [64, 64]

    key = jax.random.PRNGKey(0)
    kx1, kx2, kp = jax.random.split(key, 3)
    params = init_params(kp, input_dim, hidden_dims)

    # Small batch: exercises the pad-to-128 / single-tile path.
    x_small = jax.random.normal(kx1, (16, input_dim), dtype=jnp.float32)
    v_small = jax.block_until_ready(lyapunov_forward(x_small, params))
    ref_small = _reference_forward(x_small, params)
    assert v_small.shape == (16, 1)
    assert jnp.allclose(v_small, ref_small, atol=2e-3, rtol=2e-3)

    # Larger batch: exercises the multi-tile path (grid = 2 with batch_tile=512).
    x_big = jax.random.normal(kx2, (1024, input_dim), dtype=jnp.float32)
    v_big = jax.block_until_ready(lyapunov_forward(x_big, params, batch_tile=512))
    ref_big = _reference_forward(x_big, params)
    assert v_big.shape == (1024, 1)
    assert jnp.allclose(v_big, ref_big, atol=2e-3, rtol=2e-3)

    print("KERNEL_OK")
</pallas_src>

<mosaic_0001>
module attributes {stable_mosaic.version = 11 : i64} {
  func.func @_lyapunov_mlp_kernel(%arg0: i32, %arg1: memref<128x4xf32, #tpu.memory_space<vmem>>, %arg2: memref<4x64xf32, #tpu.memory_space<vmem>>, %arg3: memref<1x64xf32, #tpu.memory_space<vmem>>, %arg4: memref<64x64xbf16, #tpu.memory_space<vmem>>, %arg5: memref<1x64xf32, #tpu.memory_space<vmem>>, %arg6: memref<8x64xf32, #tpu.memory_space<vmem>>, %arg7: memref<1x1xf32, #tpu.memory_space<smem>>, %arg8: memref<1x128xf32, #tpu.memory_space<vmem>>) attributes {dimension_semantics = [#tpu.dimension_semantics<parallel>], iteration_bounds = array<i64: 1>, scalar_prefetch = 0 : i64, scratch_operands = 0 : i64, tpu.core_type = #tpu.core_type<tc>, window_params = [{transform_indices = @transform_0, window_bounds = array<i64: 128, 4>}, {pipeline_mode = #tpu.pipeline_mode<synchronous>, transform_indices = @transform_1, window_bounds = array<i64: 4, 64>}, {pipeline_mode = #tpu.pipeline_mode<synchronous>, transform_indices = @transform_2, window_bounds = array<i64: 1, 64>}, {pipeline_mode = #tpu.pipeline_mode<synchronous>, transform_indices = @transform_3, window_bounds = array<i64: 64, 64>}, {pipeline_mode = #tpu.pipeline_mode<synchronous>, transform_indices = @transform_4, window_bounds = array<i64: 1, 64>}, {pipeline_mode = #tpu.pipeline_mode<synchronous>, transform_indices = @transform_5, window_bounds = array<i64: 8, 64>}, {transform_indices = @transform_6, window_bounds = array<i64: 1, 1>}, {transform_indices = @transform_7, window_bounds = array<i64: 1, 128>}]} {
    %c0 = arith.constant 0 : index
    %c0_0 = arith.constant 0 : index
    %0 = vector.load %arg1[%c0, %c0_0] : memref<128x4xf32, #tpu.memory_space<vmem>>, vector<128x4xf32>
    %1 = vector.extract_strided_slice %0 {offsets = [0, 0], sizes = [128, 1], strides = [1, 1]} : vector<128x4xf32> to vector<128x1xf32>
    %c0_1 = arith.constant 0 : index
    %c0_2 = arith.constant 0 : index
    %2 = vector.load %arg2[%c0_1, %c0_2] : memref<4x64xf32, #tpu.memory_space<vmem>>, vector<1x64xf32>
    %3 = vector.broadcast %1 : vector<128x1xf32> to vector<128x64xf32>
    %4 = vector.broadcast %2 : vector<1x64xf32> to vector<128x64xf32>
    %5 = arith.mulf %3, %4 : vector<128x64xf32>
    %6 = vector.extract_strided_slice %0 {offsets = [0, 1], sizes = [128, 1], strides = [1, 1]} : vector<128x4xf32> to vector<128x1xf32>
    %c1 = arith.constant 1 : index
    %c0_3 = arith.constant 0 : index
    %7 = vector.load %arg2[%c1, %c0_3] : memref<4x64xf32, #tpu.memory_space<vmem>>, vector<1x64xf32>
    %8 = vector.broadcast %6 : vector<128x1xf32> to vector<128x64xf32>
    %9 = vector.broadcast %7 : vector<1x64xf32> to vector<128x64xf32>
    %10 = arith.mulf %8, %9 : vector<128x64xf32>
    %11 = arith.addf %5, %10 : vector<128x64xf32>
    %12 = vector.extract_strided_slice %0 {offsets = [0, 2], sizes = [128, 1], strides = [1, 1]} : vector<128x4xf32> to vector<128x1xf32>
    %c2 = arith.constant 2 : index
    %c0_4 = arith.constant 0 : index
    %13 = vector.load %arg2[%c2, %c0_4] : memref<4x64xf32, #tpu.memory_space<vmem>>, vector<1x64xf32>
    %14 = vector.broadcast %12 : vector<128x1xf32> to vector<128x64xf32>
    %15 = vector.broadcast %13 : vector<1x64xf32> to vector<128x64xf32>
    %16 = arith.mulf %14, %15 : vector<128x64xf32>
    %17 = arith.addf %11, %16 : vector<128x64xf32>
    %18 = vector.extract_strided_slice %0 {offsets = [0, 3], sizes = [128, 1], strides = [1, 1]} : vector<128x4xf32> to vector<128x1xf32>
    %c3 = arith.constant 3 : index
    %c0_5 = arith.constant 0 : index
    %19 = vector.load %arg2[%c3, %c0_5] : memref<4x64xf32, #tpu.memory_space<vmem>>, vector<1x64xf32>
    %20 = vector.broadcast %18 : vector<128x1xf32> to vector<128x64xf32>
    %21 = vector.broadcast %19 : vector<1x64xf32> to vector<128x64xf32>
    %22 = arith.mulf %20, %21 : vector<128x64xf32>
    %23 = arith.addf %17, %22 : vector<128x64xf32>
    %c0_6 = arith.constant 0 : index
    %c0_7 = arith.constant 0 : index
    %24 = vector.load %arg3[%c0_6, %c0_7] : memref<1x64xf32, #tpu.memory_space<vmem>>, vector<1x64xf32>
    %25 = vector.broadcast %24 : vector<1x64xf32> to vector<128x64xf32>
    %26 = arith.addf %23, %25 : vector<128x64xf32>
    %cst = arith.constant 0.000000e+00 : f32
    %27 = vector.broadcast %cst : f32 to vector<128x64xf32>
    %28 = arith.maximumf %26, %27 : vector<128x64xf32>
    %29 = arith.truncf %28 : vector<128x64xf32> to vector<128x64xbf16>
    %c0_8 = arith.constant 0 : index
    %c0_9 = arith.constant 0 : index
    %30 = vector.load %arg4[%c0_8, %c0_9] : memref<64x64xbf16, #tpu.memory_space<vmem>>, vector<64x64xbf16>
    %cst_10 = arith.constant dense<0.000000e+00> : vector<128x64xf32>
    %31 = tpu.matmul %29, %30, %cst_10 {dimension_numbers = #tpu.dot_dimension_numbers<[1], [0], [0], [1], [0, 0, 1, 1], [], []>} : vector<128x64xbf16>, vector<64x64xbf16>, vector<128x64xf32> -> vector<128x64xf32>
    %c0_11 = arith.constant 0 : index
    %c0_12 = arith.constant 0 : index
    %32 = vector.load %arg5[%c0_11, %c0_12] : memref<1x64xf32, #tpu.memory_space<vmem>>, vector<1x64xf32>
    %33 = vector.broadcast %32 : vector<1x64xf32> to vector<128x64xf32>
    %34 = arith.addf %31, %33 : vector<128x64xf32>
    %cst_13 = arith.constant 0.000000e+00 : f32
    %35 = vector.broadcast %cst_13 : f32 to vector<128x64xf32>
    %36 = arith.maximumf %34, %35 : vector<128x64xf32>
    %c0_14 = arith.constant 0 : index
    %c0_15 = arith.constant 0 : index
    %37 = vector.load %arg6[%c0_14, %c0_15] : memref<8x64xf32, #tpu.memory_space<vmem>>, vector<8x64xf32>
    %cst_16 = arith.constant dense<0.000000e+00> : vector<8x128xf32>
    %38 = tpu.matmul %37, %36, %cst_16 {dimension_numbers = #tpu.dot_dimension_numbers<[1], [1], [0], [0], [0, 0, 1, 0], [], []>} : vector<8x64xf32>, vector<128x64xf32>, vector<8x128xf32> -> vector<8x128xf32>
    %39 = vector.extract_strided_slice %38 {offsets = [0, 0], sizes = [1, 128], strides = [1, 1]} : vector<8x128xf32> to vector<1x128xf32>
    %c0_17 = arith.constant 0 : index
    %c0_18 = arith.constant 0 : index
    %40 = memref.load %arg7[%c0_17, %c0_18] : memref<1x1xf32, #tpu.memory_space<smem>>
    %41 = vector.broadcast %40 : f32 to vector<1x128xf32>
    %42 = arith.addf %39, %41 : vector<1x128xf32>
    %cst_19 = arith.constant 0.000000e+00 : f32
    %43 = vector.broadcast %cst_19 : f32 to vector<1x128xf32>
    %44 = arith.maximumf %42, %43 : vector<1x128xf32>
    %45 = math.absf %42 : vector<1x128xf32>
    %cst_20 = arith.constant 0.000000e+00 : f32
    %46 = vector.broadcast %cst_20 : f32 to vector<1x128xf32>
    %47 = arith.subf %46, %45 : vector<1x128xf32>
    %48 = math.exp %47 : vector<1x128xf32>
    %49 = math.log1p %48 : vector<1x128xf32>
    %50 = arith.addf %44, %49 : vector<1x128xf32>
    %c0_21 = arith.constant 0 : index
    %c0_22 = arith.constant 0 : index
    %51 = vector.load %arg8[%c0_21, %c0_22] : memref<1x128xf32, #tpu.memory_space<vmem>>, vector<1x128xf32>
    tpu.vector_store %arg8[%c0_21, %c0_22], %50 {strides = array<i32>} : memref<1x128xf32, #tpu.memory_space<vmem>>, vector<1x128xf32>,
    return
  }
  func.func @transform_0(%arg0: i32) -> (i32, i32) {
    %c0_i32 = arith.constant 0 : i32
    %c0_i32_0 = arith.constant 0 : i32
    return %arg0, %c0_i32 : i32, i32
  }
  func.func @transform_1(%arg0: i32) -> (i32, i32) {
    %c0_i32 = arith.constant 0 : i32
    %c0_i32_0 = arith.constant 0 : i32
    %c0_i32_1 = arith.constant 0 : i32
    return %c0_i32, %c0_i32_0 : i32, i32
  }
  func.func @transform_2(%arg0: i32) -> (i32, i32) {
    %c0_i32 = arith.constant 0 : i32
    %c0_i32_0 = arith.constant 0 : i32
    %c0_i32_1 = arith.constant 0 : i32
    return %c0_i32, %c0_i32_0 : i32, i32
  }
  func.func @transform_3(%arg0: i32) -> (i32, i32) {
    %c0_i32 = arith.constant 0 : i32
    %c0_i32_0 = arith.constant 0 : i32
    %c0_i32_1 = arith.constant 0 : i32
    return %c0_i32, %c0_i32_0 : i32, i32
  }
  func.func @transform_4(%arg0: i32) -> (i32, i32) {
    %c0_i32 = arith.constant 0 : i32
    %c0_i32_0 = arith.constant 0 : i32
    %c0_i32_1 = arith.constant 0 : i32
    return %c0_i32, %c0_i32_0 : i32, i32
  }
  func.func @transform_5(%arg0: i32) -> (i32, i32) {
    %c0_i32 = arith.constant 0 : i32
    %c0_i32_0 = arith.constant 0 : i32
    %c0_i32_1 = arith.constant 0 : i32
    return %c0_i32, %c0_i32_0 : i32, i32
  }
  func.func @transform_6(%arg0: i32) -> (i32, i32) {
    %c0_i32 = arith.constant 0 : i32
    %c0_i32_0 = arith.constant 0 : i32
    %c0_i32_1 = arith.constant 0 : i32
    return %c0_i32, %c0_i32_0 : i32, i32
  }
  func.func @transform_7(%arg0: i32) -> (i32, i32) {
    %c0_i32 = arith.constant 0 : i32
    %c0_i32_0 = arith.constant 0 : i32
    return %c0_i32, %arg0 : i32, i32
  }
}

</mosaic_0001>

<bundles_post_ra>
// kernel: tpu_custom_call.1
= control target key start
LH: loop header
LB: loop body
LE: loop exit
PB: predicated region body
PF: predicated region fallthrough
CT: control target
= control target key end

     0   :  { %v1015_v1 = vmov 1   ;;  %v1016_v2 = vmov 0   ;;  %s1389_s0 = inlined_call_operand.vmem [shape: f32[128,4], index: 0, kind: input, shape index: {}]   ;;  %s1390_s1 = inlined_call_operand.vmem [shape: f32[4,64], index: 1, kind: input, shape index: {}]   ;;  %s1391_s2 = inlined_call_operand.vmem [shape: f32[1,64], index: 2, kind: input, shape index: {}]   ;;  %s1392_s3 = inlined_call_operand.vmem [shape: bf16[64,64], index: 3, kind: input, shape index: {}]   ;;  %s1393_s4 = inlined_call_operand.vmem [shape: f32[1,64], index: 4, kind: input, shape index: {}]   ;;  %s1394_s5 = inlined_call_operand.vmem [shape: f32[8,64], index: 5, kind: input, shape index: {}]   ;;  %s1395_s6 = inlined_call_operand.<no memory space> [shape: f32[1,1], index: 6, kind: input, shape index: {}]   ;;  %s1396_s7 = inlined_call_operand.hbm [shape: f32[1,128], index: 7, kind: output, shape index: {}]  }
   0x1   :  { %v1065_v0 = vld [vmem:[%s1389_s0] sm:$0xff]  ;;  %959 = vset.pattern.permute.xlu1 %v1015_v1  ;;  %958 = vset.pattern.permute.xlu0 %v1016_v2  ;;  %v30_v3 = vld [vmem:[%s1389_s0 + $0x8] sm:$0xff]  ;;  %v31_v4 = vld [vmem:[%s1389_s0 + $0x10] sm:$0xff] }
   0x2   :  { %148 = vperm.xlu1 %959, %v1065_v0   ;;  %48 = vperm.xlu0 %958, %v1065_v0   ;;  %v1080_v5 = vld [vmem:[%s1389_s0 + $0x18] sm:$0xff] }
   0x6   :  { %152 = vperm.xlu1 %959, %v30_v3   ;;  %53 = vperm.xlu0 %958, %v30_v3  }
   0x7   :  { %13 = vsyncpa [#allocation4], 0  ;;  %v34_v6 = vld [vmem:[%s1389_s0 + $0x28] sm:$0xff]  ;;  %v35_v7 = vld [vmem:[%s1389_s0 + $0x30] sm:$0xff]  ;;  %v1017_v9 = vmov 2   ;;  %v1018_v13 = vmov 3  }
   0x8   :  { %v1095_v8 = vld [vmem:[%s1389_s0 + $0x48] sm:$0xff]  ;;  %v1103_v10 = vld [vmem:[%s1389_s0 + $0x50] sm:$0xff]  ;;  %v33_v14 = vld [vmem:[%s1389_s0 + $0x20] sm:$0xff]  ;;  %vm535_vm0 = vcmask 523264   ;;  %vm1020_vm1 = vmmov 0  }
   0x9   :  { %v1109_v11 = vld [vmem:[%s1389_s0 + $0x68] sm:$0xff]  ;;  %v1116_v12 = vld [vmem:[%s1389_s0 + $0x70] sm:$0xff]  ;;  %v36_v15 = vld [vmem:[%s1389_s0 + $0x38] sm:$0xff] }
   0xa   :  { %960 = vset.pattern.permute.xlu1 %v1016_v2  ;;  %58 = vperm.xlu0 %958, %v31_v4   ;;  %v985_v16 = vld [vmem:[%s1392_s3 + $0x18] sm:$0xff]   ;;  %v986_v17 = vld [vmem:[%s1392_s3 + $0x10] sm:$0xff]   ;;  %v987_v18 = vld [vmem:[%s1392_s3 + $0x8] sm:$0xff]  }
   0xb   :  { %63 = vperm.xlu1 %960, %v1080_v5   ;;  %892 = vmatprep.subr.bf16.mxu0 %v985_v16  ;;  %v988_v19 = vld [vmem:[%s1392_s3] sm:$0xff]   ;;  %v40_v21 = vld [vmem:[%s1389_s0 + $0x58] sm:$0xff] }
   0xc   :  { %893 = vmatpush3.bf16.msra.mxu0 %v985_v16  ;;  %v37_v20 = vld [vmem:[%s1389_s0 + $0x40] sm:$0xff]  ;;  %v44_v23 = vld [vmem:[%s1389_s0 + $0x78] sm:$0xff] }
   0xd   :  { %894 = vmatprep.subr.bf16.mxu0 %v986_v17  ;;  %v41_v22 = vld [vmem:[%s1389_s0 + $0x60] sm:$0xff] }
   0xe   :  { %73 = vperm.xlu0 %958, %v34_v6   ;;  %v1201_v45 = vld [vmem:[%s1390_s1] ss:$0 sm:$0xff]  ;;  %v1207_v47 = vld [vmem:[%s1390_s1 + $0x1] ss:$0 sm:$0xff] }
   0xf   :  { %961 = vset.pattern.permute.xlu1 %v1015_v1 }
  0x10   :  { %160 = vperm.xlu1 %961, %v1080_v5   ;;  %895 = vmatpush3.bf16.msra.mxu0 %v986_v17 }
  0x11   :  { %896 = vmatprep.subr.bf16.mxu0 %v987_v18 }
  0x12   :  { %78 = vperm.xlu0 %958, %v35_v7  }
  0x14   :  { %962 = vset.pattern.permute.xlu1 %v1017_v9  ;;  %897 = vmatpush3.bf16.msra.mxu0 %v987_v18 }
  0x15   :  { %249 = vperm.xlu1 %962, %v1065_v0   ;;  %898 = vmatprep.subr.bf16.mxu0 %v988_v19 }
  0x16   :  { %93 = vperm.xlu0 %958, %v1095_v8  }
  0x18   :  { %899 = vmatpush3.bf16.msra.mxu0 %v988_v19 }
  0x19   :  { %257 = vperm.xlu1 %962, %v31_v4  }
  0x1a   :  { %98 = vperm.xlu0 %958, %v1103_v10  }
  0x1d   :  { %261 = vperm.xlu1 %962, %v1080_v5  }
  0x1e   :  { %113 = vperm.xlu0 %958, %v1109_v11  }
  0x21   :  { %963 = vset.pattern.permute.xlu1 %v1018_v13 }
  0x22   :  { %354 = vperm.xlu1 %963, %v30_v3   ;;  %118 = vperm.xlu0 %958, %v1116_v12  }
  0x26   :  { %358 = vperm.xlu1 %963, %v31_v4   ;;  %978 = vset.pattern.permute.xlu0 %v1015_v1 }
  0x27   :  { %156 = vperm.xlu0 %978, %v31_v4  }
  0x2a   :  { %964 = vset.pattern.permute.xlu1 %v1016_v2 }
  0x2b   :  { %68 = vperm.xlu1 %964, %v33_v14   ;;  %172 = vperm.xlu0 %978, %v35_v7  }
  0x2f   :  { %965 = vset.pattern.permute.xlu1 %v1015_v1  ;;  %188 = vperm.xlu0 %978, %v1103_v10  }
  0x30   :  { %164 = vperm.xlu1 %965, %v33_v14  }
  0x33   :  { %204 = vperm.xlu0 %978, %v1116_v12  }
  0x34   :  { %168 = vperm.xlu1 %965, %v34_v6  }
  0x37   :  { %980 = vset.pattern.permute.xlu0 %v1017_v9 }
  0x38   :  { %966 = vset.pattern.permute.xlu1 %v1016_v2  ;;  %253 = vperm.xlu0 %980, %v30_v3  }
  0x39   :  { %83 = vperm.xlu1 %966, %v36_v15  }
  0x3c   :  { %269 = vperm.xlu0 %980, %v34_v6  }
  0x3d   :  { %967 = vset.pattern.permute.xlu1 %v1015_v1 }
  0x3e   :  { %176 = vperm.xlu1 %967, %v36_v15  }
  0x40   :  { %285 = vperm.xlu0 %980, %v1095_v8  }
  0x42   :  { %968 = vset.pattern.permute.xlu1 %v1017_v9 }
  0x43   :  { %265 = vperm.xlu1 %968, %v33_v14  }
  0x44   :  { %301 = vperm.xlu0 %980, %v1109_v11  }
  0x47   :  { %273 = vperm.xlu1 %968, %v35_v7  }
  0x48   :  { %983 = vset.pattern.permute.xlu0 %v1018_v13 }
  0x49   :  { %350 = vperm.xlu0 %983, %v1065_v0   ;;  %v1225_v0 = vld [vmem:[%s1390_s1 + $0x2] ss:$0 sm:$0xff] }
  0x4b   :  { %277 = vperm.xlu1 %968, %v36_v15  }
  0x4d   :  { %362 = vperm.xlu0 %983, %v1080_v5   ;;  %v1234_v5 = vld [vmem:[%s1390_s1 + $0x3] ss:$0 sm:$0xff] }
  0x4f   :  { %969 = vset.pattern.permute.xlu1 %v1018_v13 }
  0x50   :  { %370 = vperm.xlu1 %969, %v34_v6  }
  0x51   :  { %366 = vperm.xlu0 %983, %v33_v14  }
  0x54   :  { %374 = vperm.xlu1 %969, %v35_v7  }
  0x55   :  { %378 = vperm.xlu0 %983, %v36_v15  }
  0x58   :  { %970 = vset.pattern.permute.xlu1 %v1016_v2 }
  0x59   :  { %88 = vperm.xlu1 %970, %v37_v20   ;;  %382 = vperm.xlu0 %983, %v37_v20  }
  0x5d   :  { %971 = vset.pattern.permute.xlu1 %v1015_v1  ;;  %394 = vperm.xlu0 %983, %v40_v21  }
  0x5e   :  { %180 = vperm.xlu1 %971, %v37_v20  }
  0x61   :  { %398 = vperm.xlu0 %983, %v41_v22  }
  0x62   :  { %184 = vperm.xlu1 %971, %v1095_v8  }
  0x65   :  { %410 = vperm.xlu0 %983, %v44_v23  }
  0x66   :  { %972 = vset.pattern.permute.xlu1 %v1016_v2 }
  0x67   :  { %103 = vperm.xlu1 %972, %v40_v21  }
  0x6b   :  { %973 = vset.pattern.permute.xlu1 %v1015_v1 }
  0x6c   :  { %192 = vperm.xlu1 %973, %v40_v21  }
  0x70   :  { %974 = vset.pattern.permute.xlu1 %v1017_v9 }
  0x71   :  { %281 = vperm.xlu1 %974, %v37_v20  }
  0x75   :  { %289 = vperm.xlu1 %974, %v1103_v10  }
  0x79   :  { %293 = vperm.xlu1 %974, %v40_v21  }
  0x7d   :  { %975 = vset.pattern.permute.xlu1 %v1018_v13  ;;  %v1173_v24 = vpop.permute.xlu1 %148  ;;  %v1175_v25 = vpop.permute.xlu0 %48 }
  0x7e   :  { %386 = vperm.xlu1 %975, %v1095_v8   ;;  %v215_v8 = vmul.f32 %v1207_v47, %v1173_v24 }
  0x81   :  { %v153_v26 = vpop.permute.xlu1 %152  ;;  %v54_v27 = vpop.permute.xlu0 %53 }
  0x82   :  { %390 = vperm.xlu1 %975, %v1103_v10   ;;  %v216_v60 = vmul.f32 %v1207_v47, %v153_v26  ;;  %v131_v61 = vmul.f32 %v1201_v45, %v54_v27 }
  0x84   :  { %v232_v4 = vadd.f32 %v216_v60, %v131_v61 }
  0x85   :  { %v59_v28 = vpop.permute.xlu0 %58 }
  0x86   :  { %976 = vset.pattern.permute.xlu1 %v1016_v2  ;;  %v1180_v29 = vpop.permute.xlu1 %63  ;;  %v132_v63 = vmul.f32 %v1201_v45, %v59_v28 }
  0x87   :  { %108 = vperm.xlu1 %976, %v41_v22   ;;  %v133_v20 = vmul.f32 %v1201_v45, %v1180_v29  ;;  %v1260_v29 = vld [vmem:[%s1391_s2] ss:$0 sm:$0xff] }
  0x89   :  { %v1182_v30 = vpop.permute.xlu0 %73 }
  0x8a   :  { %v135_v28 = vmul.f32 %v1201_v45, %v1182_v30 }
  0x8b   :  { %977 = vset.pattern.permute.xlu1 %v1015_v1  ;;  %v1185_v31 = vpop.permute.xlu1 %160 }
  0x8c   :  { %196 = vperm.xlu1 %977, %v41_v22   ;;  %v218_v18 = vmul.f32 %v1207_v47, %v1185_v31 }
  0x8d   :  { %v1187_v32 = vpop.permute.xlu0 %78 }
  0x8e   :  { %v136_v21 = vmul.f32 %v1201_v45, %v1187_v32 }
  0x90   :  { %200 = vperm.xlu1 %977, %v1109_v11   ;;  %v250_v33 = vpop.permute.xlu1 %249 }
  0x91   :  { %v1190_v34 = vpop.permute.xlu0 %93 }
  0x94   :  { %979 = vset.pattern.permute.xlu1 %v1016_v2  ;;  %v258_v35 = vpop.permute.xlu1 %257 }
  0x95   :  { %123 = vperm.xlu1 %979, %v44_v23   ;;  %v99_v36 = vpop.permute.xlu0 %98 }
  0x96   :  { %v140_v46 = vmul.f32 %v1201_v45, %v99_v36  ;;  %v234_v36 = vadd.f32 %v218_v18, %v133_v20 }
  0x98   :  { %v262_v37 = vpop.permute.xlu1 %261 }
  0x99   :  { %981 = vset.pattern.permute.xlu1 %v1015_v1  ;;  %v1194_v38 = vpop.permute.xlu0 %113 }
  0x9a   :  { %208 = vperm.xlu1 %981, %v44_v23  }
  0x9d   :  { %v355_v39 = vpop.permute.xlu1 %354  ;;  %v119_v40 = vpop.permute.xlu0 %118 }
  0x9e   :  { %982 = vset.pattern.permute.xlu1 %v1017_v9  ;;  %v144_v51 = vmul.f32 %v1201_v45, %v119_v40  ;;  %v130_v9 = vmul.f32 %v1201_v45, %v1175_v25  ;;  %v418_v14 = vmul.f32 %v1234_v5, %v355_v39  ;;  %v319_v25 = vmul.f32 %v1225_v0, %v262_v37 }
  0x9f   :  { %297 = vperm.xlu1 %982, %v41_v22  }
  0xa0   :  { %v231_v17 = vadd.f32 %v215_v8, %v130_v9 }
  0xa1   :  { %v359_v41 = vpop.permute.xlu1 %358 }
  0xa2   :  { %v157_v42 = vpop.permute.xlu0 %156  ;;  %v419_v22 = vmul.f32 %v1234_v5, %v359_v41 }
  0xa3   :  { %305 = vperm.xlu1 %982, %v1116_v12   ;;  %v217_v1 = vmul.f32 %v1207_v47, %v157_v42 }
  0xa5   :  { %v233_v6 = vadd.f32 %v217_v1, %v132_v63 }
  0xa6   :  { %v69_v43 = vpop.permute.xlu1 %68  ;;  %v173_v44 = vpop.permute.xlu0 %172 }
  0xa7   :  { %309 = vperm.xlu1 %982, %v44_v23   ;;  %v221_v26 = vmul.f32 %v1207_v47, %v173_v44  ;;  %v134_v40 = vmul.f32 %v1201_v45, %v69_v43  ;;  %v335_v44 = vadd.f32 %v319_v25, %v234_v36 }
  0xaa   :  { %v189_v48 = vpop.permute.xlu0 %188 }
  0xab   :  { %984 = vset.pattern.permute.xlu1 %v1018_v13  ;;  %v165_v49 = vpop.permute.xlu1 %164  ;;  %v225_v50 = vmul.f32 %v1207_v47, %v189_v48  ;;  %v316_v13 = vmul.f32 %v1225_v0, %v250_v33 }
  0xac   :  { %402 = vperm.xlu1 %984, %v1109_v11   ;;  %v219_v32 = vmul.f32 %v1207_v47, %v165_v49 }
  0xad   :  { %v1213_v52 = vadd.f32 %v225_v50, %v140_v46  ;;  %v332_v24 = vadd.f32 %v316_v13, %v231_v17  ;;  %v237_v46 = vadd.f32 %v221_v26, %v136_v21 }
  0xae   :  { %v205_v53 = vpop.permute.xlu0 %204 }
  0xaf   :  { %v169_v54 = vpop.permute.xlu1 %168  ;;  %v229_v55 = vmul.f32 %v1207_v47, %v205_v53 }
  0xb0   :  { %406 = vperm.xlu1 %984, %v1116_v12   ;;  %v318_v12 = vmul.f32 %v1225_v0, %v258_v35  ;;  %v220_v33 = vmul.f32 %v1207_v47, %v169_v54 }
  0xb1   :  { %v1217_v56 = vadd.f32 %v229_v55, %v144_v51  ;;  %v235_v51 = vadd.f32 %v219_v32, %v134_v40 }
  0xb2   :  { %v334_v15 = vadd.f32 %v318_v12, %v233_v6  ;;  %v236_v53 = vadd.f32 %v220_v33, %v135_v28 }
  0xb3   :  { %v254_v57 = vpop.permute.xlu0 %253 }
  0xb4   :  { %v84_v58 = vpop.permute.xlu1 %83  ;;  %v317_v2 = vmul.f32 %v1225_v0, %v254_v57  ;;  %v435_v31 = vadd.f32 %v419_v22, %v334_v15 }
  0xb5   :  { %v137_v54 = vmul.f32 %v1201_v45, %v84_v58 }
  0xb6   :  { %v333_v10 = vadd.f32 %v317_v2, %v232_v4  ;;  %v458_v50 = vadd.f32 %v1260_v29, %v435_v31 }
  0xb7   :  { %v270_v59 = vpop.permute.xlu0 %269 }
  0xb8   :  { %v434_v19 = vadd.f32 %v418_v14, %v333_v10  ;;  %v321_v41 = vmul.f32 %v1225_v0, %v270_v59  ;;  %v474_v10 = vmax.f32 %v458_v50, 0.0 }
  0xb9   :  { %v177_v62 = vpop.permute.xlu1 %176 }
  0xba   :  { %v457_v39 = vadd.f32 %v1260_v29, %v434_v19  ;;  %v222_v43 = vmul.f32 %v1207_v47, %v177_v62  ;;  %v337_v61 = vadd.f32 %v321_v41, %v236_v53 }
  0xbb   :  { %v1229_v3 = vpop.permute.xlu0 %285 }
  0xbc   :  { %v473_v60 = vmax.f32 %v457_v39, 0.0  ;;  %v238_v62 = vadd.f32 %v222_v43, %v137_v54  ;;  %v139_v54 = vmul.f32 %v1201_v45, %v1190_v34 }
  0xbe   :  { %v266_v7 = vpop.permute.xlu1 %265 }
  0xbf   :  { %v1240_v11 = vpop.permute.xlu0 %301  ;;  %v320_v30 = vmul.f32 %v1225_v0, %v266_v7 }
  0xc1   :  { %v336_v63 = vadd.f32 %v320_v30, %v235_v51 }
  0xc2   :  { %v274_v16 = vpop.permute.xlu1 %273 }
  0xc3   :  { %v322_v1 = vmul.f32 %v1225_v0, %v274_v16 }
  0xc4   :  { %v351_v23 = vpop.permute.xlu0 %350 }
  0xc5   :  { %v417_v27 = vmul.f32 %v1234_v5, %v351_v23  ;;  %v338_v15 = vadd.f32 %v322_v1, %v237_v46 }
  0xc6   :  { %v278_v35 = vpop.permute.xlu1 %277 }
  0xc7   :  { %v433_v37 = vadd.f32 %v417_v27, %v332_v24  ;;  %v323_v6 = vmul.f32 %v1225_v0, %v278_v35 }
  0xc8   :  { %v363_v42 = vpop.permute.xlu0 %362 }
  0xc9   :  { %v420_v48 = vmul.f32 %v1234_v5, %v363_v42  ;;  %v456_v49 = vadd.f32 %v1260_v29, %v433_v37  ;;  %v339_v19 = vadd.f32 %v323_v6, %v238_v62 }
  0xcb   :  { %v436_v55 = vadd.f32 %v420_v48, %v335_v44  ;;  %v371_v57 = vpop.permute.xlu1 %370  ;;  %v472_v59 = vmax.f32 %v456_v49, 0.0 }
  0xcc   :  { %v422_v2 = vmul.f32 %v1234_v5, %v371_v57  ;;  %v367_v4 = vpop.permute.xlu0 %366 }
  0xcd   :  { %v459_v7 = vadd.f32 %v1260_v29, %v436_v55  ;;  %v421_v8 = vmul.f32 %v1234_v5, %v367_v4  ;;  %v488_v58 = vpack.c.bf16 %v473_v60, %v472_v59 }
  0xce   :  { %v438_v9 = vadd.f32 %v422_v2, %v337_v61 }
  0xcf   :  { %v475_v12 = vmax.f32 %v459_v7, 0.0  ;;  %v437_v13 = vadd.f32 %v421_v8, %v336_v63  ;;  %v375_v14 = vpop.permute.xlu1 %374  ;;  %900 = vmatprep.mubr.msk.bf16.mxu0 %vm535_vm0, %v488_v58  ;;  %v325_v63 = vmul.f32 %v1225_v0, %v1229_v3 }
  0xd0   :  { %v461_v16 = vadd.f32 %v1260_v29, %v438_v9  ;;  %v423_v17 = vmul.f32 %v1234_v5, %v375_v14  ;;  %v379_v18 = vpop.permute.xlu0 %378 }
  0xd1   :  { %v489_v20 = vpack.c.bf16 %v475_v12, %v474_v10  ;;  %v460_v21 = vadd.f32 %v1260_v29, %v437_v13  ;;  %v424_v22 = vmul.f32 %v1234_v5, %v379_v18 }
  0xd2   :  { %v477_v23 = vmax.f32 %v461_v16, 0.0  ;;  %v439_v24 = vadd.f32 %v423_v17, %v338_v15 }
  0xd3   :  { %v476_v25 = vmax.f32 %v460_v21, 0.0  ;;  %v440_v26 = vadd.f32 %v424_v22, %v339_v19  ;;  %901 = vmatmul.mubr.msk.bf16.vlgmr.msra.gmra.mxu0 %vm535_vm0, %v489_v20 }
  0xd4   :  { %v462_v27 = vadd.f32 %v1260_v29, %v439_v24  ;;  %v89_v28 = vpop.permute.xlu1 %88  ;;  %v383_v49 = vpop.permute.xlu0 %382 }
  0xd5   :  { %v490_v31 = vpack.c.bf16 %v477_v23, %v476_v25  ;;  %v463_v32 = vadd.f32 %v1260_v29, %v440_v26  ;;  %v138_v44 = vmul.f32 %v1201_v45, %v89_v28  ;;  %v425_v57 = vmul.f32 %v1234_v5, %v383_v49 }
  0xd6   :  { %v478_v33 = vmax.f32 %v462_v27, 0.0  ;;  %v143_v27 = vmul.f32 %v1201_v45, %v1194_v38 }
  0xd7   :  { %v479_v35 = vmax.f32 %v463_v32, 0.0  ;;  %904 = vmatprep.mubr.msk.bf16.mxu0 %vm535_vm0, %v490_v31  ;;  %v329_v31 = vmul.f32 %v1225_v0, %v1240_v11 }
  0xd8   :  { %v395_v61 = vpop.permute.xlu0 %394 }
  0xd9   :  { %v491_v36 = vpack.c.bf16 %v479_v35, %v478_v33  ;;  %v181_v37 = vpop.permute.xlu1 %180  ;;  %v428_v7 = vmul.f32 %v1234_v5, %v395_v61 }
  0xda   :  { %v223_v42 = vmul.f32 %v1207_v47, %v181_v37 }
  0xdb   :  { %905 = vmatmul.mubr.msk.bf16.gmra.mxu0 %vm535_vm0, %v491_v36 }
  0xdc   :  { %v239_v50 = vadd.f32 %v223_v42, %v138_v44  ;;  %v399_v42 = vpop.permute.xlu0 %398 }
  0xdd   :  { %v185_v39 = vpop.permute.xlu1 %184 }
  0xde   :  { %v224_v51 = vmul.f32 %v1207_v47, %v185_v39 }
  0xe0   :  { %v240_v1 = vadd.f32 %v224_v51, %v139_v54 }
  0xe2   :  { %v104_v40 = vpop.permute.xlu1 %103  ;;  %v341_v58 = vadd.f32 %v325_v63, %v240_v1 }
  0xe3   :  { %v141_v43 = vmul.f32 %v1201_v45, %v104_v40 }
  0xe7   :  { %v193_v41 = vpop.permute.xlu1 %192 }
  0xe8   :  { %v226_v53 = vmul.f32 %v1207_v47, %v193_v41 }
  0xea   :  { %v242_v2 = vadd.f32 %v226_v53, %v141_v43  ;;  %v411_v53 = vpop.permute.xlu0 %410 }
  0xec   :  { %v282_v30 = vpop.permute.xlu1 %281 }
  0xed   :  { %v324_v46 = vmul.f32 %v1225_v0, %v282_v30 }
  0xef   :  { %v340_v55 = vadd.f32 %v324_v46, %v239_v50  ;;  %v429_v50 = vmul.f32 %v1234_v5, %v399_v42 }
  0xf0   :  { %v290_v48 = vpop.permute.xlu1 %289 }
  0xf1   :  { %v441_v4 = vadd.f32 %v425_v57, %v340_v55  ;;  %v326_v34 = vmul.f32 %v1225_v0, %v290_v48  ;;  %v432_v57 = vmul.f32 %v1234_v5, %v411_v53 }
  0xf3   :  { %v464_v62 = vadd.f32 %v1260_v29, %v441_v4  ;;  %v342_v14 = vadd.f32 %v326_v34, %v1213_v52 }
  0xf4   :  { %v294_v59 = vpop.permute.xlu1 %293 }
  0xf5   :  { %v327_v60 = vmul.f32 %v1225_v0, %v294_v59  ;;  %v480_v16 = vmax.f32 %v464_v62, 0.0 }
  0xf7   :  { %v343_v6 = vadd.f32 %v327_v60, %v242_v2 }
  0xf9   :  { %v387_v8 = vpop.permute.xlu1 %386  ;;  %v444_v10 = vadd.f32 %v428_v7, %v343_v6 }
  0xfa   :  { %v426_v9 = vmul.f32 %v1234_v5, %v387_v8 }
  0xfb   :  { %v467_v17 = vadd.f32 %v1260_v29, %v444_v10 }
  0xfc   :  { %v442_v12 = vadd.f32 %v426_v9, %v341_v58 }
  0xfd   :  { %v391_v13 = vpop.permute.xlu1 %390  ;;  %v483_v23 = vmax.f32 %v467_v17, 0.0 }
  0xfe   :  { %v465_v3 = vadd.f32 %v1260_v29, %v442_v12  ;;  %v427_v15 = vmul.f32 %v1234_v5, %v391_v13 }
 0x100   :  { %v481_v18 = vmax.f32 %v465_v3, 0.0  ;;  %v443_v19 = vadd.f32 %v427_v15, %v342_v14 }
 0x102   :  { %v492_v20 = vpack.c.bf16 %v481_v18, %v480_v16  ;;  %v466_v21 = vadd.f32 %v1260_v29, %v443_v19  ;;  %v109_v22 = vpop.permute.xlu1 %108 }
 0x103   :  { %v142_v40 = vmul.f32 %v1201_v45, %v109_v22 }
 0x104   :  { %v482_v24 = vmax.f32 %v466_v21, 0.0  ;;  %908 = vmatprep.mubr.msk.bf16.mxu0 %vm535_vm0, %v492_v20 }
 0x106   :  { %v493_v25 = vpack.c.bf16 %v483_v23, %v482_v24  ;;  %v833_v23 = vld [vmem:[%s1393_s4] ss:$0 sm:$0xff] }
 0x107   :  { %v197_v26 = vpop.permute.xlu1 %196 }
 0x108   :  { %909 = vmatmul.mubr.msk.bf16.gmra.mxu0 %vm535_vm0, %v493_v25  ;;  %v227_v39 = vmul.f32 %v1207_v47, %v197_v26 }
 0x10a   :  { %v243_v44 = vadd.f32 %v227_v39, %v142_v40 }
 0x10b   :  { %v201_v52 = vpop.permute.xlu1 %200 }
 0x10c   :  { %v228_v28 = vmul.f32 %v1207_v47, %v201_v52 }
 0x10e   :  { %v244_v32 = vadd.f32 %v228_v28, %v143_v27 }
 0x110   :  { %v124_v33 = vpop.permute.xlu1 %123  ;;  %v345_v35 = vadd.f32 %v329_v31, %v244_v32 }
 0x111   :  { %v145_v46 = vmul.f32 %v1201_v45, %v124_v33 }
 0x115   :  { %v209_v36 = vpop.permute.xlu1 %208 }
 0x116   :  { %v230_v38 = vmul.f32 %v1207_v47, %v209_v36 }
 0x118   :  { %v246_v51 = vadd.f32 %v230_v38, %v145_v46 }
 0x11a   :  { %v298_v37 = vpop.permute.xlu1 %297 }
 0x11b   :  { %v328_v41 = vmul.f32 %v1225_v0, %v298_v37 }
 0x11d   :  { %v344_v48 = vadd.f32 %v328_v41, %v243_v44 }
 0x11e   :  { %v306_v30 = vpop.permute.xlu1 %305 }
 0x11f   :  { %v445_v54 = vadd.f32 %v429_v50, %v344_v48  ;;  %v330_v59 = vmul.f32 %v1225_v0, %v306_v30 }
 0x121   :  { %v468_v47 = vadd.f32 %v1260_v29, %v445_v54  ;;  %v346_v1 = vadd.f32 %v330_v59, %v1217_v56  ;;  %v1019_v56 = vmov 0.0  }
 0x122   :  { %v310_v11 = vpop.permute.xlu1 %309  ;;  %916 = vmatprep.subr.mxu1 %v1019_v56  ;;  %948 = vmatprep.mubr.msk.f32.mxu1 %vm1020_vm1, %v1019_v56 }
 0x123   :  { %v331_v49 = vmul.f32 %v1225_v0, %v310_v11  ;;  %v484_v6 = vmax.f32 %v468_v47, 0.0 }
 0x125   :  { %v347_v43 = vadd.f32 %v331_v49, %v246_v51 }
 0x127   :  { %v403_v55 = vpop.permute.xlu1 %402  ;;  %v448_v45 = vadd.f32 %v432_v57, %v347_v43 }
 0x128   :  { %v430_v60 = vmul.f32 %v1234_v5, %v403_v55 }
 0x129   :  { %v471_v7 = vadd.f32 %v1260_v29, %v448_v45 }
 0x12a   :  { %v446_v61 = vadd.f32 %v430_v60, %v345_v35 }
 0x12b   :  { %v407_v63 = vpop.permute.xlu1 %406  ;;  %v487_v9 = vmax.f32 %v471_v7, 0.0 }
 0x12c   :  { %v469_v2 = vadd.f32 %v1260_v29, %v446_v61  ;;  %v431_v4 = vmul.f32 %v1234_v5, %v407_v63  ;;  %v673_v61 = vld [vmem:[%s1394_s5] sm:$0xff]  ;;  %v796_v63 = vstv %s1395_s6  ;;  %s1021_s5 = smov [#allocation3]  }
 0x12d   :  { %s820_s29 = sshll.u32 %s1021_s5, 4  ;;  %s821_s29 = int_to_ptr.vmem [resolvable:$true] %s820_s29 }
 0x12e   :  { %v485_v8 = vmax.f32 %v469_v2, 0.0  ;;  %v447_v34 = vadd.f32 %v431_v4, %v346_v1  ;;  %s993_s6 = scalar_lea.vmem %s821_s29, 16  ;;  %s997_s30 = scalar_lea.vmem %s821_s29, 32 }
 0x12f   :  { %p994_p0 = scmp.ne.s32.totalorder %s821_s29, %s993_s6  ;;  %p998_p1 = scmp.lt.s32.totalorder %s821_s29, %s821_s29 }
 0x130   :  { %v494_v58 = vpack.c.bf16 %v485_v8, %v484_v6  ;;  %v470_v0 = vadd.f32 %v1260_v29, %v447_v34  ;;  %p999_p2 = scmp.lt.s32.totalorder %s997_s30, %s993_s6 }
 0x132   :  { %v486_v62 = vmax.f32 %v470_v0, 0.0  ;;  %912 = vmatprep.mubr.msk.bf16.mxu0 %vm535_vm0, %v494_v58  ;;  %p1000_p3 = por %p999_p2, %p998_p1 }
 0x134   :  { %v495_v10 = vpack.c.bf16 %v487_v9, %v486_v62  ;;  %p1001_p4 = pnand %p1000_p3, %p994_p0 }
 0x136   :  { %913 = vmatmul.mubr.msk.bf16.gmra.mxu0 %vm535_vm0, %v495_v10 }
 0x193   :  { %v1336_v5 = vpop.f32.mrf.mxu0 }
 0x194   :  { %v603_v43 = vadd.f32 %v1336_v5, %v833_v23 }
 0x195   :  { %v1338_v12 = vpop.f32.mrf.mxu0 }
 0x196   :  { %v659_v57 = vmax.f32 %v603_v43, 0.0  ;;  %v595_v60 = vadd.f32 %v833_v23, %v1338_v12 }
 0x197   :  { %v903_v13 = vpop.f32.mrf.mxu0 }
 0x198   :  { %v606_v53 = vadd.f32 %v903_v13, %v833_v23  ;;  %v657_v45 = vmax.f32 %v595_v60, 0.0 }
 0x199   :  { %v1340_v14 = vpop.f32.mrf.mxu0 }
 0x19a   :  { %v660_v55 = vmax.f32 %v606_v53, 0.0  ;;  %v598_v59 = vadd.f32 %v833_v23, %v1340_v14 }
 0x19b   :  { %v906_v29 = vpop.f32.mrf.mxu0 }
 0x19c   :  { %v619_v46 = vadd.f32 %v906_v29, %v833_v23  ;;  %v658_v47 = vmax.f32 %v598_v59, 0.0 }
 0x19d   :  { %v610_v3 = vpop.f32.mrf.mxu0 }
 0x19e   :  { %v663_v11 = vmax.f32 %v619_v46, 0.0  ;;  %v611_v50 = vadd.f32 %v833_v23, %v610_v3 }
 0x19f   :  { %v907_v15 = vpop.f32.mrf.mxu0 }
 0x1a0   :  { %v622_v44 = vadd.f32 %v907_v15, %v833_v23  ;;  %v661_v54 = vmax.f32 %v611_v50, 0.0 }
 0x1a1   :  { %v613_v16 = vpop.f32.mrf.mxu0 }
 0x1a2   :  { %v664_v48 = vmax.f32 %v622_v44, 0.0  ;;  %v614_v49 = vadd.f32 %v833_v23, %v613_v16 }
 0x1a4   :  { %v662_v51 = vmax.f32 %v614_v49, 0.0 }
 0x1c8   :  { %v910_v17 = vpop.f32.mrf.mxu0 }
 0x1c9   :  { %v635_v37 = vadd.f32 %v910_v17, %v833_v23 }
 0x1ca   :  { %v626_v18 = vpop.f32.mrf.mxu0 }
 0x1cb   :  { %v667_v40 = vmax.f32 %v635_v37, 0.0  ;;  %v627_v30 = vadd.f32 %v833_v23, %v626_v18 }
 0x1cc   :  { %v911_v19 = vpop.f32.mrf.mxu0 }
 0x1cd   :  { %v638_v35 = vadd.f32 %v911_v19, %v833_v23  ;;  %v665_v38 = vmax.f32 %v627_v30, 0.0 }
 0x1ce   :  { %v629_v20 = vpop.f32.mrf.mxu0 }
 0x1cf   :  { %v668_v39 = vmax.f32 %v638_v35, 0.0  ;;  %v630_v41 = vadd.f32 %v833_v23, %v629_v20 }
 0x1d1   :  { %v666_v42 = vmax.f32 %v630_v41, 0.0 }
 0x1f6   :  { %v914_v21 = vpop.f32.mrf.mxu0 }
 0x1f7   :  { %v651_v26 = vadd.f32 %v914_v21, %v833_v23 }
 0x1f8   :  { %v642_v22 = vpop.f32.mrf.mxu0 }
 0x1f9   :  { %v671_v28 = vmax.f32 %v651_v26, 0.0  ;;  %v643_v32 = vadd.f32 %v833_v23, %v642_v22 }
 0x1fa   :  { %v915_v24 = vpop.f32.mrf.mxu0 }
 0x1fb   :  { %v654_v25 = vadd.f32 %v915_v24, %v833_v23  ;;  %v669_v36 = vmax.f32 %v643_v32, 0.0 }
 0x1fc   :  { %v645_v27 = vpop.f32.mrf.mxu0 }
 0x1fd   :  { %v672_v52 = vmax.f32 %v654_v25, 0.0  ;;  %v646_v31 = vadd.f32 %v833_v23, %v645_v27 }
 0x1ff   :  { %917 = vmatpush3.xpose.msk.msra.mxu1 %vm535_vm0, %v672_v52  ;;  %v670_v33 = vmax.f32 %v646_v31, 0.0 }
 0x200   :  { %918 = vmatprep.subr.mxu1 %v1019_v56 }
 0x203   :  { %919 = vmatpush3.xpose.msk.msra.mxu1 %vm535_vm0, %v671_v28 }
 0x204   :  { %920 = vmatprep.subr.mxu1 %v1019_v56 }
 0x207   :  { %921 = vmatpush3.xpose.msk.msra.mxu1 %vm535_vm0, %v670_v33 }
 0x208   :  { %922 = vmatprep.subr.mxu1 %v1019_v56 }
 0x20b   :  { %923 = vmatpush3.xpose.msk.msra.mxu1 %vm535_vm0, %v669_v36 }
 0x20c   :  { %924 = vmatprep.subr.mxu1 %v1019_v56 }
 0x20f   :  { %925 = vmatpush3.xpose.msk.msra.mxu1 %vm535_vm0, %v668_v39 }
 0x210   :  { %926 = vmatprep.subr.mxu1 %v1019_v56 }
 0x213   :  { %927 = vmatpush3.xpose.msk.msra.mxu1 %vm535_vm0, %v667_v40 }
 0x214   :  { %928 = vmatprep.subr.mxu1 %v1019_v56 }
 0x217   :  { %929 = vmatpush3.xpose.msk.msra.mxu1 %vm535_vm0, %v666_v42 }
 0x218   :  { %930 = vmatprep.subr.mxu1 %v1019_v56 }
 0x21b   :  { %931 = vmatpush3.xpose.msk.msra.mxu1 %vm535_vm0, %v665_v38 }
 0x21c   :  { %932 = vmatprep.subr.mxu1 %v1019_v56 }
 0x21f   :  { %933 = vmatpush3.xpose.msk.msra.mxu1 %vm535_vm0, %v664_v48 }
 0x220   :  { %934 = vmatprep.subr.mxu1 %v1019_v56 }
 0x223   :  { %935 = vmatpush3.xpose.msk.msra.mxu1 %vm535_vm0, %v663_v11 }
 0x224   :  { %936 = vmatprep.subr.mxu1 %v1019_v56 }
 0x227   :  { %937 = vmatpush3.xpose.msk.msra.mxu1 %vm535_vm0, %v662_v51 }
 0x228   :  { %938 = vmatprep.subr.mxu1 %v1019_v56 }
 0x22b   :  { %939 = vmatpush3.xpose.msk.msra.mxu1 %vm535_vm0, %v661_v54 }
 0x22c   :  { %940 = vmatprep.subr.mxu1 %v1019_v56 }
 0x22f   :  { %941 = vmatpush3.xpose.msk.msra.mxu1 %vm535_vm0, %v660_v55 }
 0x230   :  { %942 = vmatprep.subr.mxu1 %v1019_v56 }
 0x233   :  { %943 = vmatpush3.xpose.msk.msra.mxu1 %vm535_vm0, %v659_v57 }
 0x234   :  { %944 = vmatprep.subr.mxu1 %v1019_v56 }
 0x237   :  { %945 = vmatpush3.xpose.msk.msra.mxu1 %vm535_vm0, %v658_v47 }
 0x238   :  { %946 = vmatprep.subr.mxu1 %v1019_v56 }
 0x23b   :  { %947 = vmatpush3.xpose.msk.msra.mxu1 %vm535_vm0, %v657_v45 }
 0x23e   :  { %949 = vmatmul.mubr.msk.f32.vlgmr.msra.gmra.mxu1 %vm535_vm0, %v673_v61 }
 0x2fe   :  { %v791_v1 = vpop.f32.mrf.mxu1 }
 0x2ff   :  { %v797_v2 = vadd.f32 %v796_v63, %v791_v1 }
 0x300   :  { %v950_v4 = vpop.f32.mrf.mxu1 }
 0x301   :  { %v799_v6 = vand.u32 2147483647, %v797_v2  ;;  %v798_v12 = vmax.f32 %v797_v2, 0.0 }
 0x303   :  { %v800_v7 = vsub.f32 0.0, %v799_v6 }
 0x305   :  { %v801_v8 = vmul.f32 1.442695, %v800_v7 }
 0x307   :  { %989 = vpow2.f32 %v801_v8 }
 0x314   :  { %v990_v34 = vpop.eup %989 }
 0x315   :  { %v803_v58 = vadd.f32 1.0, %v990_v34  ;;  %v806_v0 = vmul.f32 -0.5, %v990_v34  ;;  %v809_v62 = vand.u32 2147483647, %v990_v34 }
 0x317   :  { %991 = vlog2.f32 %v803_v58  ;;  %v807_v9 = vadd.f32 1.0, %v806_v0  ;;  %vm810_vm2 = vcmp.lt.f32.partialorder %v809_v62, 0.0004427343 }
 0x319   :  { %v808_v5 = vmul.f32 %v990_v34, %v807_v9 }
 0x324   :  { %v992_v10 = vpop.eup %991 }
 0x325   :  { %v805_v56 = vmul.f32 0.6931472, %v992_v10 }
 0x327   :  { %v811_v13 = vsel %vm810_vm2, %v808_v5, %v805_v56 }
 0x328   :  { %v812_v14 = vadd.f32 %v811_v13, %v798_v12 }
 0x32a   :  { %813 = vst [vmem:[#allocation3] sm:$0x1] %v812_v14 }
 0x32b   :  { %1004 = shalt.err (!%p1001_p4)
}
 0x32c   :  { %823 = dma.vmem_to_hbm [thread:$0]  %s821_s29, 16, %s1396_s7, [#allocation4]  }
 0x32d   :  { %1013 = dma.done.wait [#allocation4], 16  }
 0x32e   :  { %1014 = vsyncadd [#allocation4], 4294967280 }
 0x32f   :  { %827 = vsyncpa [#allocation4], 1 }

</bundles_post_ra>
